<compile_context>
chip_gen: v6e
topology: v6e:2x2x1
jax: 0.10.0
libtpu: 0.0.40
codegen_flags: <defaults>
</compile_context>

<pallas_src>
import jax
import jax.numpy as jnp
from jax.experimental import pallas as pl
from jax.experimental.pallas import tpu as pltpu


def _round_up(n, m):
    return ((n + m - 1) // m) * m


# ----------------------------------------------------------------------------
# Pallas kernel: fused conv1(1x1) -> SiLU -> conv2(1x1) -> + residual
# ----------------------------------------------------------------------------
def _conv1d_residual_kernel(x_ref, w1_ref, b1_ref, w2_ref, b2_ref, o_ref):
    # x_ref: (TM, Cp) f32 tile of rows; weights are bf16, biases f32.
    x = x_ref[...]                                    # keep f32 for residual
    x_bf = x.astype(jnp.bfloat16)                     # bf16 operand for the MXU
    # conv1 (kernel_size=1): bf16 x bf16 -> f32 accumulate
    z = jnp.dot(x_bf, w1_ref[...], preferred_element_type=jnp.float32) + b1_ref[...]
    a = z * jax.nn.sigmoid(z)                         # SiLU in f32 (EUP + VALU)
    # conv2 (kernel_size=1) + residual (residual add stays f32)
    y = x + jnp.dot(a.astype(jnp.bfloat16), w2_ref[...],
                    preferred_element_type=jnp.float32) + b2_ref[...]
    o_ref[...] = y.astype(o_ref.dtype)


def _conv1d_residual_rows(x_rows, w1, b1, w2, b2, *, tm):
    m, cp = x_rows.shape
    hp = w1.shape[1]
    assert m % tm == 0
    grid = (m // tm,)
    flops = 2 * m * cp * hp * 2                       # two (M,Cp)x(Cp,Hp)-class matmuls
    bytes_accessed = (2 * m * cp * 4                  # x in + y out (f32)
                      + (w1.size + w2.size) * 2       # bf16 weights
                      + (b1.size + b2.size) * 4)      # f32 biases
    return pl.pallas_call(
        _conv1d_residual_kernel,
        out_shape=jax.ShapeDtypeStruct((m, cp), jnp.float32),
        grid_spec=pltpu.PrefetchScalarGridSpec(
            num_scalar_prefetch=0,
            grid=grid,
            in_specs=[
                pl.BlockSpec((tm, cp), lambda i: (i, 0)),   # x tile, pipelined
                pl.BlockSpec((cp, hp), lambda i: (0, 0)),   # w1 resident in VMEM
                pl.BlockSpec((1, hp), lambda i: (0, 0)),    # b1 resident
                pl.BlockSpec((hp, cp), lambda i: (0, 0)),   # w2 resident
                pl.BlockSpec((1, cp), lambda i: (0, 0)),    # b2 resident
            ],
            out_specs=pl.BlockSpec((tm, cp), lambda i: (i, 0)),
        ),
        compiler_params=pltpu.CompilerParams(
            dimension_semantics=("parallel",),        # shard row-tiles across TCs (v7x)
            vmem_limit_bytes=64 * 1024 * 1024,
        ),
        cost_estimate=pl.CostEstimate(
            flops=flops,
            transcendentals=m * hp,                   # sigmoid per hidden element
            bytes_accessed=bytes_accessed,
        ),
    )(x_rows, w1, b1, w2, b2)


# ----------------------------------------------------------------------------
# Parameters (mirrors Conv1dResidual.__init__ shapes) + kernel-facing packing
# ----------------------------------------------------------------------------
def build_conv1d_residual_params(key, in_channels, hidden_size=None):
    hidden = hidden_size or in_channels // 2
    k1, k2, k3, k4 = jax.random.split(key, 4)
    # PyTorch Conv1d weights: conv1 (H, C, 1), conv2 (C, H, 1)
    w1 = 0.1 * jax.random.normal(k1, (hidden, in_channels, 1), jnp.float32)
    b1 = 0.1 * jax.random.normal(k2, (hidden,), jnp.float32)
    w2 = 0.1 * jax.random.normal(k3, (in_channels, hidden, 1), jnp.float32)
    b2 = 0.1 * jax.random.normal(k4, (in_channels,), jnp.float32)
    return dict(w1=w1, b1=b1, w2=w2, b2=b2)


def pack_params_for_kernel(params):
    """Zero-pad channel dims to multiples of 128 (lane-dense) and cast weights to bf16."""
    w1, b1, w2, b2 = params['w1'], params['b1'], params['w2'], params['b2']
    h, c, _ = w1.shape
    cp = _round_up(c, 128)
    hp = _round_up(h, 128)
    w1m = jnp.zeros((cp, hp), jnp.bfloat16).at[:c, :h].set(
        w1[:, :, 0].T.astype(jnp.bfloat16))          # rows: x @ W1^T
    b1m = jnp.zeros((1, hp), jnp.float32).at[:, :h].set(b1)
    w2m = jnp.zeros((hp, cp), jnp.bfloat16).at[:h, :c].set(
        w2[:, :, 0].T.astype(jnp.bfloat16))
    b2m = jnp.zeros((1, cp), jnp.float32).at[:, :c].set(b2)
    return dict(w1=w1m, b1=b1m, w2=w2m, b2=b2m, c=c, cp=cp, hp=hp)


# ----------------------------------------------------------------------------
# Forward pass (NCL in / NCL out, same as the PyTorch module)
# ----------------------------------------------------------------------------
def conv1d_residual_forward(kparams, x, *, tm=512):
    """x: (B, C, L) float32 (PyTorch Conv1d NCL layout)."""
    b, c, l = x.shape
    cp = kparams['cp']
    m = b * l
    # channels-last rows: one row per (batch, position), channels on lanes
    rows = x.transpose(0, 2, 1).reshape(m, c)
    # Pick TM (<=512 keeps double-buffered tiles well under v7x's 64 MiB VMEM);
    # pad rows to a TM multiple and channels to the lane-dense Cp.
    tm_eff = min(tm, _round_up(m, 8))
    m_pad = _round_up(m, tm_eff)
    rows = jnp.pad(rows, ((0, m_pad - m), (0, cp - c)))
    y = _conv1d_residual_rows(rows, kparams['w1'], kparams['b1'],
                              kparams['w2'], kparams['b2'], tm=tm_eff)
    # slice off row / channel padding, back to NCL
    return y[:m, :c].reshape(b, l, c).transpose(0, 2, 1)


# pure-JAX reference for correctness checking
def conv1d_residual_reference(params, x):
    w1 = params['w1'][:, :, 0]      # (H, C)
    w2 = params['w2'][:, :, 0]      # (C, H)
    z = jnp.einsum('hc,bcl->bhl', w1, x) + params['b1'][None, :, None]
    a = z * jax.nn.sigmoid(z)
    y = jnp.einsum('ch,bhl->bcl', w2, a) + params['b2'][None, :, None]
    return x + y


# ----------------------------------------------------------------------------
if __name__ == "__main__":
    B, C, L = 2, 8, 16                 # small shapes consistent with the module
    key = jax.random.PRNGKey(0)
    key, kx, kp = jax.random.split(key, 3)
    x = jax.random.normal(kx, (B, C, L), jnp.float32)

    params = build_conv1d_residual_params(kp, in_channels=C)   # hidden = C // 2
    kparams = pack_params_for_kernel(params)

    out = conv1d_residual_forward(kparams, x)
    jax.block_until_ready(out)
    assert out.shape == (B, C, L), out.shape

    ref = conv1d_residual_reference(params, x)
    max_err = float(jnp.max(jnp.abs(out - ref)))
    assert jnp.allclose(out, ref, rtol=5e-2, atol=5e-2), max_err

    print("KERNEL_OK")
</pallas_src>

<mosaic_0001>
module attributes {stable_mosaic.version = 11 : i64} {
  func.func @_conv1d_residual_kernel(%arg0: i32, %arg1: memref<32x128xf32, #tpu.memory_space<vmem>>, %arg2: memref<128x128xbf16, #tpu.memory_space<vmem>>, %arg3: memref<1x128xf32, #tpu.memory_space<vmem>>, %arg4: memref<128x128xbf16, #tpu.memory_space<vmem>>, %arg5: memref<1x128xf32, #tpu.memory_space<vmem>>, %arg6: memref<32x128xf32, #tpu.memory_space<vmem>>) attributes {dimension_semantics = [#tpu.dimension_semantics<parallel>], iteration_bounds = array<i64: 1>, scalar_prefetch = 0 : i64, scratch_operands = 0 : i64, tpu.core_type = #tpu.core_type<tc>, window_params = [{transform_indices = @transform_0, window_bounds = array<i64: 32, 128>}, {pipeline_mode = #tpu.pipeline_mode<synchronous>, transform_indices = @transform_1, window_bounds = array<i64: 128, 128>}, {pipeline_mode = #tpu.pipeline_mode<synchronous>, transform_indices = @transform_2, window_bounds = array<i64: 1, 128>}, {pipeline_mode = #tpu.pipeline_mode<synchronous>, transform_indices = @transform_3, window_bounds = array<i64: 128, 128>}, {pipeline_mode = #tpu.pipeline_mode<synchronous>, transform_indices = @transform_4, window_bounds = array<i64: 1, 128>}, {transform_indices = @transform_5, window_bounds = array<i64: 32, 128>}]} {
    %c0 = arith.constant 0 : index
    %c0_0 = arith.constant 0 : index
    %0 = vector.load %arg1[%c0, %c0_0] : memref<32x128xf32, #tpu.memory_space<vmem>>, vector<32x128xf32>
    %1 = arith.truncf %0 : vector<32x128xf32> to vector<32x128xbf16>
    %c0_1 = arith.constant 0 : index
    %c0_2 = arith.constant 0 : index
    %2 = vector.load %arg2[%c0_1, %c0_2] : memref<128x128xbf16, #tpu.memory_space<vmem>>, vector<128x128xbf16>
    %cst = arith.constant dense<0.000000e+00> : vector<32x128xf32>
    %3 = tpu.matmul %1, %2, %cst {dimension_numbers = #tpu.dot_dimension_numbers<[1], [0], [0], [1], [0, 0, 1, 1], [], []>} : vector<32x128xbf16>, vector<128x128xbf16>, vector<32x128xf32> -> vector<32x128xf32>
    %c0_3 = arith.constant 0 : index
    %c0_4 = arith.constant 0 : index
    %4 = vector.load %arg3[%c0_3, %c0_4] : memref<1x128xf32, #tpu.memory_space<vmem>>, vector<1x128xf32>
    %5 = vector.broadcast %4 : vector<1x128xf32> to vector<32x128xf32>
    %6 = arith.addf %3, %5 : vector<32x128xf32>
    %7 = arith.negf %6 : vector<32x128xf32>
    %8 = math.exp %7 : vector<32x128xf32>
    %cst_5 = arith.constant 1.000000e+00 : f32
    %9 = vector.broadcast %cst_5 : f32 to vector<32x128xf32>
    %10 = arith.addf %9, %8 : vector<32x128xf32>
    %11 = arith.divf %9, %10 : vector<32x128xf32>
    %12 = arith.mulf %6, %11 : vector<32x128xf32>
    %13 = arith.truncf %12 : vector<32x128xf32> to vector<32x128xbf16>
    %c0_6 = arith.constant 0 : index
    %c0_7 = arith.constant 0 : index
    %14 = vector.load %arg4[%c0_6, %c0_7] : memref<128x128xbf16, #tpu.memory_space<vmem>>, vector<128x128xbf16>
    %cst_8 = arith.constant dense<0.000000e+00> : vector<32x128xf32>
    %15 = tpu.matmul %13, %14, %cst_8 {dimension_numbers = #tpu.dot_dimension_numbers<[1], [0], [0], [1], [0, 0, 1, 1], [], []>} : vector<32x128xbf16>, vector<128x128xbf16>, vector<32x128xf32> -> vector<32x128xf32>
    %16 = arith.addf %0, %15 : vector<32x128xf32>
    %c0_9 = arith.constant 0 : index
    %c0_10 = arith.constant 0 : index
    %17 = vector.load %arg5[%c0_9, %c0_10] : memref<1x128xf32, #tpu.memory_space<vmem>>, vector<1x128xf32>
    %18 = vector.broadcast %17 : vector<1x128xf32> to vector<32x128xf32>
    %19 = arith.addf %16, %18 : vector<32x128xf32>
    %c0_11 = arith.constant 0 : index
    %c0_12 = arith.constant 0 : index
    %20 = vector.load %arg6[%c0_11, %c0_12] : memref<32x128xf32, #tpu.memory_space<vmem>>, vector<32x128xf32>
    tpu.vector_store %arg6[%c0_11, %c0_12], %19 {strides = array<i32>} : memref<32x128xf32, #tpu.memory_space<vmem>>, vector<32x128xf32>,
    return
  }
  func.func @transform_0(%arg0: i32) -> (i32, i32) {
    %c0_i32 = arith.constant 0 : i32
    %c0_i32_0 = arith.constant 0 : i32
    return %arg0, %c0_i32 : i32, i32
  }
  func.func @transform_1(%arg0: i32) -> (i32, i32) {
    %c0_i32 = arith.constant 0 : i32
    %c0_i32_0 = arith.constant 0 : i32
    %c0_i32_1 = arith.constant 0 : i32
    return %c0_i32, %c0_i32_0 : i32, i32
  }
  func.func @transform_2(%arg0: i32) -> (i32, i32) {
    %c0_i32 = arith.constant 0 : i32
    %c0_i32_0 = arith.constant 0 : i32
    %c0_i32_1 = arith.constant 0 : i32
    return %c0_i32, %c0_i32_0 : i32, i32
  }
  func.func @transform_3(%arg0: i32) -> (i32, i32) {
    %c0_i32 = arith.constant 0 : i32
    %c0_i32_0 = arith.constant 0 : i32
    %c0_i32_1 = arith.constant 0 : i32
    return %c0_i32, %c0_i32_0 : i32, i32
  }
  func.func @transform_4(%arg0: i32) -> (i32, i32) {
    %c0_i32 = arith.constant 0 : i32
    %c0_i32_0 = arith.constant 0 : i32
    %c0_i32_1 = arith.constant 0 : i32
    return %c0_i32, %c0_i32_0 : i32, i32
  }
  func.func @transform_5(%arg0: i32) -> (i32, i32) {
    %c0_i32 = arith.constant 0 : i32
    %c0_i32_0 = arith.constant 0 : i32
    return %arg0, %c0_i32 : i32, i32
  }
}

</mosaic_0001>

<bundles_post_ra>
// kernel: tpu_custom_call.1
= control target key start
LH: loop header
LB: loop body
LE: loop exit
PB: predicated region body
PF: predicated region fallthrough
CT: control target
= control target key end

     0   :  { %10 = vsyncpa [#allocation3], 0  ;;  %s655_s0 = inlined_call_operand.hbm [shape: f32[32,128], index: 0, kind: input, shape index: {}]   ;;  %s656_s1 = inlined_call_operand.hbm [shape: bf16[128,128], index: 1, kind: input, shape index: {}]   ;;  %s657_s2 = inlined_call_operand.vmem [shape: f32[1,128], index: 2, kind: input, shape index: {}]   ;;  %s658_s3 = inlined_call_operand.hbm [shape: bf16[128,128], index: 3, kind: input, shape index: {}]   ;;  %s659_s4 = inlined_call_operand.vmem [shape: f32[1,128], index: 4, kind: input, shape index: {}]   ;;  %s660_s5 = inlined_call_operand.hbm [shape: f32[32,128], index: 5, kind: output, shape index: {}]  }
   0x1   :  { %11 = vsyncpa [#allocation6], 0 }
   0x2   :  { %12 = vsyncpa [#allocation4], 0  ;;  %s577_s18 = smov [#allocation5]  }
   0x3   :  { %s30_s19 = sshll.u32 %s577_s18, 4  ;;  %s31_s19 = int_to_ptr.vmem [resolvable:$true] %s30_s19 }
   0x4   :  { %s499_s20 = scalar_lea.vmem %s31_s19, 1024  ;;  %p504_p1 = scmp.lt.s32.totalorder %s31_s19, %s31_s19 }
   0x5   :  { %p500_p0 = scmp.ne.s32.totalorder %s31_s19, %s499_s20  ;;  %p505_p2 = scmp.lt.s32.totalorder %s499_s20, %s499_s20 }
   0x7   :  { %p506_p3 = por %p505_p2, %p504_p1 }
   0x9   :  { %p507_p4 = pnand %p506_p3, %p500_p0 }
   0xb   :  { %510 = shalt.err (!%p507_p4)
}
   0xc   :  { %s578_s21 = smov 64   ;;  %s579_s22 = smov 4  }
   0xd   :  { %36 = dma.hbm_to_vmem [thread:$0]  %s656_s1, 1024, %s31_s19, [#allocation6], %s578_s21, %s578_s21, %s579_s22  }
   0xe   :  { %s580_s25 = smov [#allocation2]  }
   0xf   :  { %s18_s26 = sshll.u32 %s580_s25, 4  ;;  %s19_s26 = int_to_ptr.vmem [resolvable:$true] %s18_s26 }
  0x10   :  { %s519_s27 = scalar_lea.vmem %s19_s26, 512  ;;  %p524_p6 = scmp.lt.s32.totalorder %s19_s26, %s19_s26 }
  0x11   :  { %p520_p5 = scmp.ne.s32.totalorder %s19_s26, %s519_s27  ;;  %p525_p7 = scmp.lt.s32.totalorder %s519_s27, %s519_s27 }
  0x13   :  { %p526_p8 = por %p525_p7, %p524_p6 }
  0x15   :  { %p527_p9 = pnand %p526_p8, %p520_p5 }
  0x17   :  { %530 = shalt.err (!%p527_p9)
}
  0x18   :  { %s581_s28 = smov 128   ;;  %s582_s29 = smov 8  }
  0x19   :  { %24 = dma.hbm_to_vmem [thread:$0]  %s655_s0, 512, %s19_s26, [#allocation3], %s581_s28, %s581_s28, %s582_s29  }
  0x1a   :  { %s583_s1 = smov [#allocation7]  }
  0x1b   :  { %s44_s7 = sshll.u32 %s583_s1, 4  ;;  %s45_s7 = int_to_ptr.vmem [resolvable:$true] %s44_s7 }
  0x1c   :  { %s539_s8 = scalar_lea.vmem %s45_s7, 1024  ;;  %p544_p11 = scmp.lt.s32.totalorder %s45_s7, %s45_s7 }
  0x1d   :  { %p540_p10 = scmp.ne.s32.totalorder %s45_s7, %s539_s8  ;;  %p545_p12 = scmp.lt.s32.totalorder %s539_s8, %s539_s8 }
  0x1f   :  { %p546_p13 = por %p545_p12, %p544_p11 }
  0x21   :  { %p547_p0 = pnand %p546_p13, %p540_p10 }
  0x23   :  { %550 = shalt.err (!%p547_p0)
}
  0x24   :  { %50 = dma.hbm_to_vmem [thread:$0]  %s658_s3, 1024, %s45_s7, [#allocation6], %s578_s21, %s578_s21, %s579_s22  }
  0x25   :  { %571 = dma.done.wait [#allocation3], 512  }
  0x26   :  { %572 = vsyncadd [#allocation3], 4294966784 }
  0x27   :  { %573 = dma.done.wait [#allocation6], 2048  }
  0x28   :  { %574 = vsyncadd [#allocation6], 4294965248  ;;  %v459_v0 = vld [vmem:[#allocation5 + $0x38] sm:$0xff]   ;;  %v460_v1 = vld [vmem:[#allocation5 + $0x30] sm:$0xff]   ;;  %s584_s12 = smov [#allocation8]  }
  0x29   :  { %411 = vmatprep.subr.bf16.mxu0 %v459_v0  ;;  %v461_v2 = vld [vmem:[#allocation5 + $0x28] sm:$0xff]   ;;  %v462_v3 = vld [vmem:[#allocation5 + $0x20] sm:$0xff]   ;;  %v463_v7 = vld [vmem:[#allocation5 + $0x18] sm:$0xff]   ;;  %s356_s13 = sshll.u32 %s584_s12, 4  ;;  %s357_s13 = int_to_ptr.vmem [resolvable:$true] %s356_s13 }
  0x2a   :  { %412 = vmatpush3.bf16.msra.mxu0 %v459_v0  ;;  %v627_v4 = vld [vmem:[#allocation2] sm:$0xff]  ;;  %v629_v5 = vld [vmem:[#allocation2 + $0x8] sm:$0xff]  ;;  %v464_v8 = vld [vmem:[#allocation5 + $0x10] sm:$0xff]   ;;  %p556_p2 = scmp.lt.s32.totalorder %s357_s13, %s357_s13 }
  0x2b   :  { %413 = vmatprep.subr.bf16.mxu0 %v460_v1  ;;  %v67_v6 = vpack.c.bf16 %v629_v5, %v627_v4  ;;  %v465_v9 = vld [vmem:[#allocation5 + $0x8] sm:$0xff]   ;;  %v466_v10 = vld [vmem:[#allocation5] sm:$0xff]   ;;  %v633_v11 = vld [vmem:[#allocation2 + $0x10] sm:$0xff] }
  0x2c   :  { %v635_v12 = vld [vmem:[#allocation2 + $0x18] sm:$0xff]  ;;  %v468_v15 = vld [vmem:[#allocation7 + $0x30] sm:$0xff]   ;;  %v469_v16 = vld [vmem:[#allocation7 + $0x28] sm:$0xff]  }
  0x2d   :  { %427 = vmatprep.mubr.bf16.mxu0 %v67_v6  ;;  %v68_v13 = vpack.c.bf16 %v635_v12, %v633_v11  ;;  %v467_v14 = vld [vmem:[#allocation7 + $0x38] sm:$0xff]   ;;  %v470_v17 = vld [vmem:[#allocation7 + $0x20] sm:$0xff]   ;;  %v472_v19 = vld [vmem:[#allocation7 + $0x10] sm:$0xff]  }
  0x2e   :  { %414 = vmatpush3.bf16.msra.mxu0 %v460_v1  ;;  %431 = vmatprep.subr.bf16.mxu1 %v467_v14  ;;  %v471_v18 = vld [vmem:[#allocation7 + $0x18] sm:$0xff]   ;;  %v473_v20 = vld [vmem:[#allocation7 + $0x8] sm:$0xff]   ;;  %v474_v21 = vld [vmem:[#allocation7] sm:$0xff]  }
  0x2f   :  { %415 = vmatprep.subr.bf16.mxu0 %v461_v2  ;;  %432 = vmatpush3.bf16.msra.mxu1 %v467_v14  ;;  %v369_v22 = vld [vmem:[%s657_s2] ss:$0 sm:$0xff] }
  0x30   :  { %433 = vmatprep.subr.bf16.mxu1 %v468_v15  ;;  %v390_v54 = vld [vmem:[%s659_s4] ss:$0 sm:$0xff]  ;;  %s551_s4 = scalar_lea.vmem %s357_s13, 512 }
  0x31   :  { %p552_p1 = scmp.ne.s32.totalorder %s357_s13, %s551_s4  ;;  %p557_p3 = scmp.lt.s32.totalorder %s551_s4, %s551_s4 }
  0x32   :  { %416 = vmatpush3.bf16.msra.mxu0 %v461_v2 }
  0x33   :  { %417 = vmatprep.subr.bf16.mxu0 %v462_v3  ;;  %434 = vmatpush3.bf16.msra.mxu1 %v468_v15  ;;  %p558_p4 = por %p557_p3, %p556_p2 }
  0x34   :  { %435 = vmatprep.subr.bf16.mxu1 %v469_v16 }
  0x35   :  { %p559_p5 = pnand %p558_p4, %p552_p1 }
  0x36   :  { %418 = vmatpush3.bf16.msra.mxu0 %v462_v3 }
  0x37   :  { %419 = vmatprep.subr.bf16.mxu0 %v463_v7  ;;  %436 = vmatpush3.bf16.msra.mxu1 %v469_v16 }
  0x38   :  { %437 = vmatprep.subr.bf16.mxu1 %v470_v17 }
  0x3a   :  { %420 = vmatpush3.bf16.msra.mxu0 %v463_v7 }
  0x3b   :  { %421 = vmatprep.subr.bf16.mxu0 %v464_v8  ;;  %438 = vmatpush3.bf16.msra.mxu1 %v470_v17 }
  0x3c   :  { %439 = vmatprep.subr.bf16.mxu1 %v471_v18 }
  0x3e   :  { %422 = vmatpush3.bf16.msra.mxu0 %v464_v8 }
  0x3f   :  { %423 = vmatprep.subr.bf16.mxu0 %v465_v9  ;;  %440 = vmatpush3.bf16.msra.mxu1 %v471_v18 }
  0x40   :  { %441 = vmatprep.subr.bf16.mxu1 %v472_v19 }
  0x42   :  { %424 = vmatpush3.bf16.msra.mxu0 %v465_v9 }
  0x43   :  { %425 = vmatprep.subr.bf16.mxu0 %v466_v10  ;;  %442 = vmatpush3.bf16.msra.mxu1 %v472_v19 }
  0x44   :  { %443 = vmatprep.subr.bf16.mxu1 %v473_v20 }
  0x46   :  { %426 = vmatpush3.bf16.msra.mxu0 %v466_v10 }
  0x47   :  { %444 = vmatpush3.bf16.msra.mxu1 %v473_v20 }
  0x48   :  { %445 = vmatprep.subr.bf16.mxu1 %v474_v21 }
  0x49   :  { %428 = vmatmul.mubr.bf16.vlgmr.msra.gmra.mxu0 %v68_v13 }
  0x4b   :  { %446 = vmatpush3.bf16.msra.mxu1 %v474_v21 }
 0x109   :  { %v429_v23 = vpop.f32.mrf.mxu0 }
 0x10a   :  { %v183_v24 = vadd.f32 %v429_v23, %v369_v22 }
 0x10b   :  { %v174_v25 = vpop.f32.mrf.mxu0 }
 0x10c   :  { %v380_v26 = vmul.f32 -1.442695, %v183_v24  ;;  %v175_v27 = vadd.f32 %v369_v22, %v174_v25 }
 0x10d   :  { %v430_v28 = vpop.f32.mrf.mxu0 }
 0x10e   :  { %v378_v29 = vmul.f32 -1.442695, %v175_v27  ;;  %v186_v30 = vadd.f32 %v430_v28, %v369_v22  ;;  %475 = vpow2.f32 %v380_v26 }
 0x10f   :  { %v177_v31 = vpop.f32.mrf.mxu0 }
 0x110   :  { %477 = vpow2.f32 %v378_v29  ;;  %v381_v32 = vmul.f32 -1.442695, %v186_v30  ;;  %v178_v33 = vadd.f32 %v369_v22, %v177_v31 }
 0x112   :  { %479 = vpow2.f32 %v381_v32  ;;  %v379_v34 = vmul.f32 -1.442695, %v178_v33 }
 0x114   :  { %481 = vpow2.f32 %v379_v34 }
 0x11b   :  { %v476_v35 = vpop.eup %475 }
 0x11c   :  { %v203_v39 = vadd.f32 1.0, %v476_v35 }
 0x11d   :  { %v478_v36 = vpop.eup %477 }
 0x11e   :  { %v201_v37 = vadd.f32 1.0, %v478_v36 }
 0x11f   :  { %v480_v38 = vpop.eup %479 }
 0x120   :  { %v204_v40 = vadd.f32 1.0, %v480_v38  ;;  %483 = vrcp.f32 %v201_v37 }
 0x121   :  { %v482_v41 = vpop.eup %481 }
 0x122   :  { %485 = vrcp.f32 %v204_v40  ;;  %v202_v42 = vadd.f32 1.0, %v482_v41 }
 0x123   :  { %487 = vrcp.f32 %v203_v39 }
 0x124   :  { %489 = vrcp.f32 %v202_v42 }
 0x12d   :  { %v484_v43 = vpop.eup %483 }
 0x12e   :  { %v213_v48 = vmul.f32 %v484_v43, %v175_v27 }
 0x12f   :  { %v486_v44 = vpop.eup %485 }
 0x130   :  { %v488_v45 = vpop.eup %487  ;;  %v216_v47 = vmul.f32 %v486_v44, %v186_v30 }
 0x131   :  { %v490_v46 = vpop.eup %489  ;;  %v215_v50 = vmul.f32 %v488_v45, %v183_v24 }
 0x132   :  { %v214_v49 = vmul.f32 %v490_v46, %v178_v33 }
 0x133   :  { %v218_v52 = vpack.c.bf16 %v216_v47, %v215_v50 }
 0x134   :  { %v217_v51 = vpack.c.bf16 %v214_v49, %v213_v48 }
 0x136   :  { %447 = vmatprep.mubr.bf16.mxu1 %v217_v51 }
 0x137   :  { %448 = vmatmul.mubr.bf16.vlgmr.msra.gmra.mxu1 %v218_v52 }
 0x1f7   :  { %v449_v53 = vpop.f32.mrf.mxu1 }
 0x1f8   :  { %v334_v55 = vadd.f32 %v449_v53, %v633_v11 }
 0x1f9   :  { %v317_v56 = vpop.f32.mrf.mxu1 }
 0x1fa   :  { %v345_v57 = vadd.f32 %v390_v54, %v334_v55  ;;  %v332_v58 = vadd.f32 %v317_v56, %v627_v4 }
 0x1fb   :  { %v450_v59 = vpop.f32.mrf.mxu1 }
 0x1fc   :  { %349 = vst [vmem:[#allocation8 + $0x10] sm:$0xff] %v345_v57  ;;  %v343_v60 = vadd.f32 %v390_v54, %v332_v58  ;;  %v335_v61 = vadd.f32 %v450_v59, %v635_v12 }
 0x1fd   :  { %v320_v62 = vpop.f32.mrf.mxu1 }
 0x1fe   :  { %347 = vst [vmem:[#allocation8] sm:$0xff] %v343_v60  ;;  %v346_v63 = vadd.f32 %v390_v54, %v335_v61  ;;  %v333_v0 = vadd.f32 %v320_v62, %v629_v5 }
 0x200   :  { %350 = vst [vmem:[#allocation8 + $0x18] sm:$0xff] %v346_v63  ;;  %v344_v1 = vadd.f32 %v390_v54, %v333_v0 }
 0x202   :  { %348 = vst [vmem:[#allocation8 + $0x8] sm:$0xff] %v344_v1 }
 0x203   :  { %562 = shalt.err (!%p559_p5)
}
 0x204   :  { %362 = dma.vmem_to_hbm [thread:$0]  %s357_s13, 512, %s660_s5, [#allocation4], %s581_s28, %s581_s28, %s582_s29  }
 0x205   :  { %575 = dma.done.wait [#allocation4], 512  }
 0x206   :  { %576 = vsyncadd [#allocation4], 4294966784 }
 0x207   :  { %366 = vsyncpa [#allocation3], 1 }
 0x208   :  { %367 = vsyncpa [#allocation6], 1 }
 0x209   :  { %368 = vsyncpa [#allocation4], 1 }

</bundles_post_ra>
